<compile_context>
chip_gen: v6e
topology: v6e:2x2x1
jax: 0.10.0
libtpu: 0.0.40
codegen_flags: <defaults>
</compile_context>

<pallas_src>
import functools
import math

import jax
import jax.numpy as jnp
from jax.experimental import pallas as pl
from jax.experimental.pallas import tpu as pltpu


def _dice_kernel(logit_ref, label_ref, inter_ref, prob_ref, lblsum_ref, *,
                 total_rows, row_tail):
    # logit_ref : (C, rows_blk, 128)      probability block for batch b
    # label_ref : (1, rows_blk, 128)      integer class-id block for batch b
    # inter_ref : (1, C-1, acc_rows, 128) per-lane partial sum(label*prob)
    # prob_ref  : (1, C-1, acc_rows, 128) per-lane partial sum(prob)
    # lblsum_ref: (1, C-1, acc_rows, 128) per-lane partial sum(label)
    k = pl.program_id(1)
    num_classes, rows, lanes = logit_ref.shape
    acc_rows = inter_ref.shape[2]

    @pl.when(k == 0)
    def _init():
        inter_ref[...] = jnp.zeros_like(inter_ref)
        prob_ref[...] = jnp.zeros_like(prob_ref)
        lblsum_ref[...] = jnp.zeros_like(lblsum_ref)

    def _fold(x):
        # (rows, 128) -> (acc_rows, 128) by summing row groups: pure vreg adds
        # (reduction over a non-minor axis), no cross-lane / XLU work.
        if rows == acc_rows:
            return x
        return x.reshape(rows // acc_rows, acc_rows, lanes).sum(axis=0)

    def _accumulate(mask):
        lbl = label_ref[0]                                  # (rows, 128) int
        for c in range(1, num_classes):                     # class 0 skipped
            p = logit_ref[c].astype(jnp.float32)            # cast in-register
            m = (lbl == c).astype(jnp.float32)              # dense one-hot slab
            if mask is not None:
                p = p * mask
                m = m * mask
            inter_ref[0, c - 1] += _fold(m * p)
            prob_ref[0, c - 1] += _fold(p)
            lblsum_ref[0, c - 1] += _fold(m)

    if row_tail:
        last = pl.num_programs(1) - 1

        @pl.when(k < last)
        def _fast():                                        # unmasked fast path
            _accumulate(None)

        @pl.when(k == last)
        def _tail():                                        # masked last chunk only
            row_id = k * rows + jax.lax.broadcasted_iota(jnp.int32, (rows, lanes), 0)
            _accumulate((row_id < total_rows).astype(jnp.float32))
    else:
        _accumulate(None)


def multiclass_dice_loss(logit, label, *, vmem_budget_bytes=12 * 1024 * 1024):
    """logit: (bs, C, Z, Y, X) probability map; label: (bs, 1, Z, Y, X) class ids."""
    bs, num_classes = logit.shape[0], logit.shape[1]
    assert num_classes > 1
    cm1 = num_classes - 1
    s = math.prod(logit.shape[2:])
    assert label.shape[0] == bs and math.prod(label.shape[1:]) == s

    lane = 128
    logit3 = logit.reshape(bs, num_classes, s)
    label3 = label.reshape(bs, 1, s)
    pad = (-s) % lane
    if pad:
        # TODO(synk): this zero-pad is one extra HBM copy; it is numerically
        # neutral (padded probs are 0 and padded labels are class 0, which the
        # loss skips).  Feed 128-aligned volumes upstream to make it vanish.
        logit3 = jnp.pad(logit3, ((0, 0), (0, 0), (0, pad)))
        label3 = jnp.pad(label3, ((0, 0), (0, 0), (0, pad)))
    s_rows = (s + pad) // lane
    logit4 = logit3.reshape(bs, num_classes, s_rows, lane)   # free reshape
    label4 = label3.reshape(bs, 1, s_rows, lane)             # free reshape

    # Rows per chunk from the VMEM budget (double-buffered logit+label blocks);
    # kept well under the scoped-VMEM default of every TPU generation
    # (16 MiB v5e / 32 MiB v6e / 32 MiB v7x) together with the f32 temporaries.
    bytes_per_row = 2 * lane * (num_classes * jnp.dtype(logit.dtype).itemsize
                                + jnp.dtype(label.dtype).itemsize)
    max_rows = max(8, (vmem_budget_bytes // bytes_per_row) // 8 * 8)
    if s_rows <= max_rows:
        rows_blk, n_chunks = s_rows, 1
    else:
        rows_blk, n_chunks = max_rows, -(-s_rows // max_rows)
    acc_rows = 8 if rows_blk % 8 == 0 else rows_blk
    row_tail = (n_chunks > 1) and (s_rows % rows_blk != 0)

    kernel = functools.partial(_dice_kernel, total_rows=s_rows, row_tail=row_tail)
    acc_sds = jax.ShapeDtypeStruct((bs, cm1, acc_rows, lane), jnp.float32)
    acc_spec = pl.BlockSpec((1, cm1, acc_rows, lane), lambda b, k: (b, 0, 0, 0))

    inter, sprob, slbl = pl.pallas_call(
        kernel,
        out_shape=(acc_sds, acc_sds, acc_sds),
        grid=(bs, n_chunks),
        in_specs=[
            pl.BlockSpec((pl.Squeezed(), num_classes, rows_blk, lane),
                         lambda b, k: (b, 0, k, 0)),
            pl.BlockSpec((pl.Squeezed(), 1, rows_blk, lane),
                         lambda b, k: (b, 0, k, 0)),
        ],
        out_specs=[acc_spec, acc_spec, acc_spec],
        compiler_params=pltpu.CompilerParams(
            dimension_semantics=("parallel", "arbitrary"),
            vmem_limit_bytes=32 * 1024 * 1024,
        ),
    )(logit4, label4)

    # Tiny host-side reduction (bs * (C-1) * acc_rows * 128 floats) + dice math.
    inter = jnp.sum(inter, axis=(-2, -1))                    # (bs, C-1)
    sprob = jnp.sum(sprob, axis=(-2, -1))
    slbl = jnp.sum(slbl, axis=(-2, -1))
    # Matches PyTorch: (2*sum(label*prob) + 0.0001) / (sum(prob) + sum(label))
    dice = (2.0 * inter + 0.0001) / (sprob + slbl)
    bs_loss = jnp.sum(dice, axis=-1) / cm1
    final_loss = -jnp.sum(bs_loss) / bs
    # TODO(synk): ignore_index is accepted by the PyTorch ctor but unused in its forward.
    return final_loss, [jax.lax.stop_gradient(final_loss)]


def _reference_loss(logit, label):
    bs, num_classes = logit.shape[0], logit.shape[1]
    total = jnp.float32(0.0)
    for b in range(bs):
        bl = jnp.float32(0.0)
        for i in range(1, num_classes):
            prob = logit[b, i].astype(jnp.float32)
            m = (label[b, 0] == i).astype(jnp.float32)
            bl += (2.0 * jnp.sum(m * prob) + 0.0001) / (jnp.sum(prob) + jnp.sum(m))
        total += bl / (num_classes - 1)
    return -total / bs


if __name__ == "__main__":
    key = jax.random.PRNGKey(0)
    k1, k2, k3, k4, k5, k6 = jax.random.split(key, 6)

    # Case 1: 128-aligned volume (S = 4*16*16 = 1024), default budget -> 1 chunk.
    bs, C, Z, Y, X = 2, 4, 4, 16, 16
    logit = jax.nn.softmax(
        jax.random.normal(k1, (bs, C, Z, Y, X), dtype=jnp.float32), axis=1)
    label = jax.random.randint(k2, (bs, 1, Z, Y, X), 0, C, dtype=jnp.int32)
    loss, _ = multiclass_dice_loss(logit, label)
    loss = jax.block_until_ready(loss)
    ref = jax.block_until_ready(_reference_loss(logit, label))
    assert jnp.allclose(loss, ref, rtol=1e-5, atol=1e-6), (loss, ref)

    # Case 2: aligned S = 8*16*16 = 2048 with a tiny budget -> 2 chunks, no tail:
    # exercises the multi-chunk accumulator path.
    logit2 = jax.nn.softmax(
        jax.random.normal(k3, (2, 4, 8, 16, 16), dtype=jnp.float32), axis=1)
    label2 = jax.random.randint(k4, (2, 1, 8, 16, 16), 0, 4, dtype=jnp.int32)
    loss2, _ = multiclass_dice_loss(logit2, label2, vmem_budget_bytes=8 * 1024)
    loss2 = jax.block_until_ready(loss2)
    ref2 = jax.block_until_ready(_reference_loss(logit2, label2))
    assert jnp.allclose(loss2, ref2, rtol=1e-5, atol=1e-6), (loss2, ref2)

    # Case 3: ragged volume (S = 5*17*13 = 1105 -> padded to 1152, 9 rows) with a
    # tiny budget -> 2 chunks with a masked ragged last chunk, C = 3.
    logit3 = jax.nn.softmax(
        jax.random.normal(k5, (2, 3, 5, 17, 13), dtype=jnp.float32), axis=1)
    label3 = jax.random.randint(k6, (2, 1, 5, 17, 13), 0, 3, dtype=jnp.int32)
    loss3, _ = multiclass_dice_loss(logit3, label3, vmem_budget_bytes=8 * 1024)
    loss3 = jax.block_until_ready(loss3)
    ref3 = jax.block_until_ready(_reference_loss(logit3, label3))
    assert jnp.allclose(loss3, ref3, rtol=1e-5, atol=1e-6), (loss3, ref3)

    print("KERNEL_OK")
</pallas_src>

<mosaic_0001>
module attributes {stable_mosaic.version = 11 : i64} {
  func.func @_dice_kernel(%arg0: i32, %arg1: i32, %arg2: memref<1x4x8x128xf32, #tpu.memory_space<vmem>>, %arg3: memref<1x1x8x128xi32, #tpu.memory_space<vmem>>, %arg4: memref<1x3x8x128xf32, #tpu.memory_space<vmem>>, %arg5: memref<1x3x8x128xf32, #tpu.memory_space<vmem>>, %arg6: memref<1x3x8x128xf32, #tpu.memory_space<vmem>>) attributes {dimension_semantics = [#tpu.dimension_semantics<parallel>, #tpu.dimension_semantics<arbitrary>], iteration_bounds = array<i64: 2, 1>, scalar_prefetch = 0 : i64, scratch_operands = 0 : i64, tpu.core_type = #tpu.core_type<tc>, window_params = [{transform_indices = @transform_0, window_bounds = array<i64: 1, 4, 8, 128>}, {transform_indices = @transform_1, window_bounds = array<i64: 1, 1, 8, 128>}, {transform_indices = @transform_2, window_bounds = array<i64: 1, 3, 8, 128>}, {transform_indices = @transform_3, window_bounds = array<i64: 1, 3, 8, 128>}, {transform_indices = @transform_4, window_bounds = array<i64: 1, 3, 8, 128>}]} {
    %c0_i32 = arith.constant 0 : i32
    %0 = arith.cmpi eq, %arg1, %c0_i32 : i32
    %1 = arith.extui %0 : i1 to i32
    %c0_i32_0 = arith.constant 0 : i32
    %2 = arith.cmpi ne, %1, %c0_i32_0 : i32
    scf.if %2 {
      %cst = arith.constant 0.000000e+00 : f32
      %80 = vector.broadcast %cst : f32 to vector<1x3x8x128xf32>
      %c0_85 = arith.constant 0 : index
      %c0_86 = arith.constant 0 : index
      %c0_87 = arith.constant 0 : index
      %c0_88 = arith.constant 0 : index
      %81 = vector.load %arg4[%c0_85, %c0_86, %c0_87, %c0_88] : memref<1x3x8x128xf32, #tpu.memory_space<vmem>>, vector<1x3x8x128xf32>
      tpu.vector_store %arg4[%c0_85, %c0_86, %c0_87, %c0_88], %80 {strides = array<i32>} : memref<1x3x8x128xf32, #tpu.memory_space<vmem>>, vector<1x3x8x128xf32>,
      %cst_89 = arith.constant 0.000000e+00 : f32
      %82 = vector.broadcast %cst_89 : f32 to vector<1x3x8x128xf32>
      %c0_90 = arith.constant 0 : index
      %c0_91 = arith.constant 0 : index
      %c0_92 = arith.constant 0 : index
      %c0_93 = arith.constant 0 : index
      %83 = vector.load %arg5[%c0_90, %c0_91, %c0_92, %c0_93] : memref<1x3x8x128xf32, #tpu.memory_space<vmem>>, vector<1x3x8x128xf32>
      tpu.vector_store %arg5[%c0_90, %c0_91, %c0_92, %c0_93], %82 {strides = array<i32>} : memref<1x3x8x128xf32, #tpu.memory_space<vmem>>, vector<1x3x8x128xf32>,
      %cst_94 = arith.constant 0.000000e+00 : f32
      %84 = vector.broadcast %cst_94 : f32 to vector<1x3x8x128xf32>
      %c0_95 = arith.constant 0 : index
      %c0_96 = arith.constant 0 : index
      %c0_97 = arith.constant 0 : index
      %c0_98 = arith.constant 0 : index
      %85 = vector.load %arg6[%c0_95, %c0_96, %c0_97, %c0_98] : memref<1x3x8x128xf32, #tpu.memory_space<vmem>>, vector<1x3x8x128xf32>
      tpu.vector_store %arg6[%c0_95, %c0_96, %c0_97, %c0_98], %84 {strides = array<i32>} : memref<1x3x8x128xf32, #tpu.memory_space<vmem>>, vector<1x3x8x128xf32>,
    } else {
    }
    %c0 = arith.constant 0 : index
    %c0_1 = arith.constant 0 : index
    %c0_2 = arith.constant 0 : index
    %c0_3 = arith.constant 0 : index
    %3 = vector.load %arg3[%c0, %c0_1, %c0_2, %c0_3] : memref<1x1x8x128xi32, #tpu.memory_space<vmem>>, vector<1x1x8x128xi32>
    %4 = vector.shape_cast %3 : vector<1x1x8x128xi32> to vector<8x128xi32>
    %c0_4 = arith.constant 0 : index
    %c1 = arith.constant 1 : index
    %c0_5 = arith.constant 0 : index
    %c0_6 = arith.constant 0 : index
    %5 = vector.load %arg2[%c0_4, %c1, %c0_5, %c0_6] : memref<1x4x8x128xf32, #tpu.memory_space<vmem>>, vector<1x1x8x128xf32>
    %6 = vector.shape_cast %5 : vector<1x1x8x128xf32> to vector<8x128xf32>
    %c1_i32 = arith.constant 1 : i32
    %7 = vector.broadcast %c1_i32 : i32 to vector<8x128xi32>
    %8 = arith.cmpi eq, %4, %7 : vector<8x128xi32>
    %9 = arith.extui %8 : vector<8x128xi1> to vector<8x128xi32>
    %10 = arith.sitofp %9 : vector<8x128xi32> to vector<8x128xf32>
    %c0_7 = arith.constant 0 : index
    %c0_8 = arith.constant 0 : index
    %c0_9 = arith.constant 0 : index
    %c0_10 = arith.constant 0 : index
    %11 = vector.load %arg4[%c0_7, %c0_8, %c0_9, %c0_10] : memref<1x3x8x128xf32, #tpu.memory_space<vmem>>, vector<1x1x8x128xf32>
    %12 = vector.shape_cast %11 : vector<1x1x8x128xf32> to vector<8x128xf32>
    %13 = arith.mulf %10, %6 : vector<8x128xf32>
    %14 = arith.addf %12, %13 : vector<8x128xf32>
    %c0_11 = arith.constant 0 : index
    %c0_12 = arith.constant 0 : index
    %c0_13 = arith.constant 0 : index
    %c0_14 = arith.constant 0 : index
    %15 = vector.load %arg4[%c0_11, %c0_12, %c0_13, %c0_14] : memref<1x3x8x128xf32, #tpu.memory_space<vmem>>, vector<1x1x8x128xf32>
    %16 = vector.shape_cast %15 : vector<1x1x8x128xf32> to vector<8x128xf32>
    %17 = vector.shape_cast %14 : vector<8x128xf32> to vector<1x1x8x128xf32>
    tpu.vector_store %arg4[%c0_11, %c0_12, %c0_13, %c0_14], %17 {strides = array<i32>} : memref<1x3x8x128xf32, #tpu.memory_space<vmem>>, vector<1x1x8x128xf32>,
    %c0_15 = arith.constant 0 : index
    %c0_16 = arith.constant 0 : index
    %c0_17 = arith.constant 0 : index
    %c0_18 = arith.constant 0 : index
    %18 = vector.load %arg5[%c0_15, %c0_16, %c0_17, %c0_18] : memref<1x3x8x128xf32, #tpu.memory_space<vmem>>, vector<1x1x8x128xf32>
    %19 = vector.shape_cast %18 : vector<1x1x8x128xf32> to vector<8x128xf32>
    %20 = arith.addf %19, %6 : vector<8x128xf32>
    %c0_19 = arith.constant 0 : index
    %c0_20 = arith.constant 0 : index
    %c0_21 = arith.constant 0 : index
    %c0_22 = arith.constant 0 : index
    %21 = vector.load %arg5[%c0_19, %c0_20, %c0_21, %c0_22] : memref<1x3x8x128xf32, #tpu.memory_space<vmem>>, vector<1x1x8x128xf32>
    %22 = vector.shape_cast %21 : vector<1x1x8x128xf32> to vector<8x128xf32>
    %23 = vector.shape_cast %20 : vector<8x128xf32> to vector<1x1x8x128xf32>
    tpu.vector_store %arg5[%c0_19, %c0_20, %c0_21, %c0_22], %23 {strides = array<i32>} : memref<1x3x8x128xf32, #tpu.memory_space<vmem>>, vector<1x1x8x128xf32>,
    %c0_23 = arith.constant 0 : index
    %c0_24 = arith.constant 0 : index
    %c0_25 = arith.constant 0 : index
    %c0_26 = arith.constant 0 : index
    %24 = vector.load %arg6[%c0_23, %c0_24, %c0_25, %c0_26] : memref<1x3x8x128xf32, #tpu.memory_space<vmem>>, vector<1x1x8x128xf32>
    %25 = vector.shape_cast %24 : vector<1x1x8x128xf32> to vector<8x128xf32>
    %26 = arith.addf %25, %10 : vector<8x128xf32>
    %c0_27 = arith.constant 0 : index
    %c0_28 = arith.constant 0 : index
    %c0_29 = arith.constant 0 : index
    %c0_30 = arith.constant 0 : index
    %27 = vector.load %arg6[%c0_27, %c0_28, %c0_29, %c0_30] : memref<1x3x8x128xf32, #tpu.memory_space<vmem>>, vector<1x1x8x128xf32>
    %28 = vector.shape_cast %27 : vector<1x1x8x128xf32> to vector<8x128xf32>
    %29 = vector.shape_cast %26 : vector<8x128xf32> to vector<1x1x8x128xf32>
    tpu.vector_store %arg6[%c0_27, %c0_28, %c0_29, %c0_30], %29 {strides = array<i32>} : memref<1x3x8x128xf32, #tpu.memory_space<vmem>>, vector<1x1x8x128xf32>,
    %c0_31 = arith.constant 0 : index
    %c2 = arith.constant 2 : index
    %c0_32 = arith.constant 0 : index
    %c0_33 = arith.constant 0 : index
    %30 = vector.load %arg2[%c0_31, %c2, %c0_32, %c0_33] : memref<1x4x8x128xf32, #tpu.memory_space<vmem>>, vector<1x1x8x128xf32>
    %31 = vector.shape_cast %30 : vector<1x1x8x128xf32> to vector<8x128xf32>
    %c2_i32 = arith.constant 2 : i32
    %32 = vector.broadcast %c2_i32 : i32 to vector<8x128xi32>
    %33 = arith.cmpi eq, %4, %32 : vector<8x128xi32>
    %34 = arith.extui %33 : vector<8x128xi1> to vector<8x128xi32>
    %35 = arith.sitofp %34 : vector<8x128xi32> to vector<8x128xf32>
    %c0_34 = arith.constant 0 : index
    %c1_35 = arith.constant 1 : index
    %c0_36 = arith.constant 0 : index
    %c0_37 = arith.constant 0 : index
    %36 = vector.load %arg4[%c0_34, %c1_35, %c0_36, %c0_37] : memref<1x3x8x128xf32, #tpu.memory_space<vmem>>, vector<1x1x8x128xf32>
    %37 = vector.shape_cast %36 : vector<1x1x8x128xf32> to vector<8x128xf32>
    %38 = arith.mulf %35, %31 : vector<8x128xf32>
    %39 = arith.addf %37, %38 : vector<8x128xf32>
    %c0_38 = arith.constant 0 : index
    %c1_39 = arith.constant 1 : index
    %c0_40 = arith.constant 0 : index
    %c0_41 = arith.constant 0 : index
    %40 = vector.load %arg4[%c0_38, %c1_39, %c0_40, %c0_41] : memref<1x3x8x128xf32, #tpu.memory_space<vmem>>, vector<1x1x8x128xf32>
    %41 = vector.shape_cast %40 : vector<1x1x8x128xf32> to vector<8x128xf32>
    %42 = vector.shape_cast %39 : vector<8x128xf32> to vector<1x1x8x128xf32>
    tpu.vector_store %arg4[%c0_38, %c1_39, %c0_40, %c0_41], %42 {strides = array<i32>} : memref<1x3x8x128xf32, #tpu.memory_space<vmem>>, vector<1x1x8x128xf32>,
    %c0_42 = arith.constant 0 : index
    %c1_43 = arith.constant 1 : index
    %c0_44 = arith.constant 0 : index
    %c0_45 = arith.constant 0 : index
    %43 = vector.load %arg5[%c0_42, %c1_43, %c0_44, %c0_45] : memref<1x3x8x128xf32, #tpu.memory_space<vmem>>, vector<1x1x8x128xf32>
    %44 = vector.shape_cast %43 : vector<1x1x8x128xf32> to vector<8x128xf32>
    %45 = arith.addf %44, %31 : vector<8x128xf32>
    %c0_46 = arith.constant 0 : index
    %c1_47 = arith.constant 1 : index
    %c0_48 = arith.constant 0 : index
    %c0_49 = arith.constant 0 : index
    %46 = vector.load %arg5[%c0_46, %c1_47, %c0_48, %c0_49] : memref<1x3x8x128xf32, #tpu.memory_space<vmem>>, vector<1x1x8x128xf32>
    %47 = vector.shape_cast %46 : vector<1x1x8x128xf32> to vector<8x128xf32>
    %48 = vector.shape_cast %45 : vector<8x128xf32> to vector<1x1x8x128xf32>
    tpu.vector_store %arg5[%c0_46, %c1_47, %c0_48, %c0_49], %48 {strides = array<i32>} : memref<1x3x8x128xf32, #tpu.memory_space<vmem>>, vector<1x1x8x128xf32>,
    %c0_50 = arith.constant 0 : index
    %c1_51 = arith.constant 1 : index
    %c0_52 = arith.constant 0 : index
    %c0_53 = arith.constant 0 : index
    %49 = vector.load %arg6[%c0_50, %c1_51, %c0_52, %c0_53] : memref<1x3x8x128xf32, #tpu.memory_space<vmem>>, vector<1x1x8x128xf32>
    %50 = vector.shape_cast %49 : vector<1x1x8x128xf32> to vector<8x128xf32>
    %51 = arith.addf %50, %35 : vector<8x128xf32>
    %c0_54 = arith.constant 0 : index
    %c1_55 = arith.constant 1 : index
    %c0_56 = arith.constant 0 : index
    %c0_57 = arith.constant 0 : index
    %52 = vector.load %arg6[%c0_54, %c1_55, %c0_56, %c0_57] : memref<1x3x8x128xf32, #tpu.memory_space<vmem>>, vector<1x1x8x128xf32>
    %53 = vector.shape_cast %52 : vector<1x1x8x128xf32> to vector<8x128xf32>
    %54 = vector.shape_cast %51 : vector<8x128xf32> to vector<1x1x8x128xf32>
    tpu.vector_store %arg6[%c0_54, %c1_55, %c0_56, %c0_57], %54 {strides = array<i32>} : memref<1x3x8x128xf32, #tpu.memory_space<vmem>>, vector<1x1x8x128xf32>,
    %c0_58 = arith.constant 0 : index
    %c3 = arith.constant 3 : index
    %c0_59 = arith.constant 0 : index
    %c0_60 = arith.constant 0 : index
    %55 = vector.load %arg2[%c0_58, %c3, %c0_59, %c0_60] : memref<1x4x8x128xf32, #tpu.memory_space<vmem>>, vector<1x1x8x128xf32>
    %56 = vector.shape_cast %55 : vector<1x1x8x128xf32> to vector<8x128xf32>
    %c3_i32 = arith.constant 3 : i32
    %57 = vector.broadcast %c3_i32 : i32 to vector<8x128xi32>
    %58 = arith.cmpi eq, %4, %57 : vector<8x128xi32>
    %59 = arith.extui %58 : vector<8x128xi1> to vector<8x128xi32>
    %60 = arith.sitofp %59 : vector<8x128xi32> to vector<8x128xf32>
    %c0_61 = arith.constant 0 : index
    %c2_62 = arith.constant 2 : index
    %c0_63 = arith.constant 0 : index
    %c0_64 = arith.constant 0 : index
    %61 = vector.load %arg4[%c0_61, %c2_62, %c0_63, %c0_64] : memref<1x3x8x128xf32, #tpu.memory_space<vmem>>, vector<1x1x8x128xf32>
    %62 = vector.shape_cast %61 : vector<1x1x8x128xf32> to vector<8x128xf32>
    %63 = arith.mulf %60, %56 : vector<8x128xf32>
    %64 = arith.addf %62, %63 : vector<8x128xf32>
    %c0_65 = arith.constant 0 : index
    %c2_66 = arith.constant 2 : index
    %c0_67 = arith.constant 0 : index
    %c0_68 = arith.constant 0 : index
    %65 = vector.load %arg4[%c0_65, %c2_66, %c0_67, %c0_68] : memref<1x3x8x128xf32, #tpu.memory_space<vmem>>, vector<1x1x8x128xf32>
    %66 = vector.shape_cast %65 : vector<1x1x8x128xf32> to vector<8x128xf32>
    %67 = vector.shape_cast %64 : vector<8x128xf32> to vector<1x1x8x128xf32>
    tpu.vector_store %arg4[%c0_65, %c2_66, %c0_67, %c0_68], %67 {strides = array<i32>} : memref<1x3x8x128xf32, #tpu.memory_space<vmem>>, vector<1x1x8x128xf32>,
    %c0_69 = arith.constant 0 : index
    %c2_70 = arith.constant 2 : index
    %c0_71 = arith.constant 0 : index
    %c0_72 = arith.constant 0 : index
    %68 = vector.load %arg5[%c0_69, %c2_70, %c0_71, %c0_72] : memref<1x3x8x128xf32, #tpu.memory_space<vmem>>, vector<1x1x8x128xf32>
    %69 = vector.shape_cast %68 : vector<1x1x8x128xf32> to vector<8x128xf32>
    %70 = arith.addf %69, %56 : vector<8x128xf32>
    %c0_73 = arith.constant 0 : index
    %c2_74 = arith.constant 2 : index
    %c0_75 = arith.constant 0 : index
    %c0_76 = arith.constant 0 : index
    %71 = vector.load %arg5[%c0_73, %c2_74, %c0_75, %c0_76] : memref<1x3x8x128xf32, #tpu.memory_space<vmem>>, vector<1x1x8x128xf32>
    %72 = vector.shape_cast %71 : vector<1x1x8x128xf32> to vector<8x128xf32>
    %73 = vector.shape_cast %70 : vector<8x128xf32> to vector<1x1x8x128xf32>
    tpu.vector_store %arg5[%c0_73, %c2_74, %c0_75, %c0_76], %73 {strides = array<i32>} : memref<1x3x8x128xf32, #tpu.memory_space<vmem>>, vector<1x1x8x128xf32>,
    %c0_77 = arith.constant 0 : index
    %c2_78 = arith.constant 2 : index
    %c0_79 = arith.constant 0 : index
    %c0_80 = arith.constant 0 : index
    %74 = vector.load %arg6[%c0_77, %c2_78, %c0_79, %c0_80] : memref<1x3x8x128xf32, #tpu.memory_space<vmem>>, vector<1x1x8x128xf32>
    %75 = vector.shape_cast %74 : vector<1x1x8x128xf32> to vector<8x128xf32>
    %76 = arith.addf %75, %60 : vector<8x128xf32>
    %c0_81 = arith.constant 0 : index
    %c2_82 = arith.constant 2 : index
    %c0_83 = arith.constant 0 : index
    %c0_84 = arith.constant 0 : index
    %77 = vector.load %arg6[%c0_81, %c2_82, %c0_83, %c0_84] : memref<1x3x8x128xf32, #tpu.memory_space<vmem>>, vector<1x1x8x128xf32>
    %78 = vector.shape_cast %77 : vector<1x1x8x128xf32> to vector<8x128xf32>
    %79 = vector.shape_cast %76 : vector<8x128xf32> to vector<1x1x8x128xf32>
    tpu.vector_store %arg6[%c0_81, %c2_82, %c0_83, %c0_84], %79 {strides = array<i32>} : memref<1x3x8x128xf32, #tpu.memory_space<vmem>>, vector<1x1x8x128xf32>,
    return
  }
  func.func @transform_0(%arg0: i32, %arg1: i32) -> (i32, i32, i32, i32) {
    %c0_i32 = arith.constant 0 : i32
    %c0_i32_0 = arith.constant 0 : i32
    %c0_i32_1 = arith.constant 0 : i32
    return %arg0, %c0_i32, %arg1, %c0_i32_0 : i32, i32, i32, i32
  }
  func.func @transform_1(%arg0: i32, %arg1: i32) -> (i32, i32, i32, i32) {
    %c0_i32 = arith.constant 0 : i32
    %c0_i32_0 = arith.constant 0 : i32
    %c0_i32_1 = arith.constant 0 : i32
    return %arg0, %c0_i32, %arg1, %c0_i32_0 : i32, i32, i32, i32
  }
  func.func @transform_2(%arg0: i32, %arg1: i32) -> (i32, i32, i32, i32) {
    %c0_i32 = arith.constant 0 : i32
    %c0_i32_0 = arith.constant 0 : i32
    %c0_i32_1 = arith.constant 0 : i32
    %c0_i32_2 = arith.constant 0 : i32
    return %arg0, %c0_i32, %c0_i32_0, %c0_i32_1 : i32, i32, i32, i32
  }
  func.func @transform_3(%arg0: i32, %arg1: i32) -> (i32, i32, i32, i32) {
    %c0_i32 = arith.constant 0 : i32
    %c0_i32_0 = arith.constant 0 : i32
    %c0_i32_1 = arith.constant 0 : i32
    %c0_i32_2 = arith.constant 0 : i32
    return %arg0, %c0_i32, %c0_i32_0, %c0_i32_1 : i32, i32, i32, i32
  }
  func.func @transform_4(%arg0: i32, %arg1: i32) -> (i32, i32, i32, i32) {
    %c0_i32 = arith.constant 0 : i32
    %c0_i32_0 = arith.constant 0 : i32
    %c0_i32_1 = arith.constant 0 : i32
    %c0_i32_2 = arith.constant 0 : i32
    return %arg0, %c0_i32, %c0_i32_0, %c0_i32_1 : i32, i32, i32, i32
  }
}

</mosaic_0001>

<bundles_post_ra>
// kernel: tpu_custom_call.1
= control target key start
LH: loop header
LB: loop body
LE: loop exit
PB: predicated region body
PF: predicated region fallthrough
CT: control target
= control target key end

     0   :  { %s1205_s0 = inlined_call_operand.hbm [shape: f32[2,4,8,128], index: 0, kind: input, shape index: {}]   ;;  %s1206_s1 = inlined_call_operand.hbm [shape: s32[2,1,8,128], index: 1, kind: input, shape index: {}]   ;;  %s1207_s2 = inlined_call_operand.hbm [shape: f32[2,3,8,128], index: 2, kind: output, shape index: {0}]   ;;  %s1208_s3 = inlined_call_operand.hbm [shape: f32[2,3,8,128], index: 3, kind: output, shape index: {1}]   ;;  %s1209_s4 = inlined_call_operand.hbm [shape: f32[2,3,8,128], index: 4, kind: output, shape index: {2}]  }
   0x1   :  { %1212 = sst [smem:[#allocation17_spill]] %s1205_s0 }
   0x2   :  { %10 = vsyncpa [#allocation3], 0 }
   0x3   :  { %12 = vsyncpa [#allocation3 + $0x1], 0 }
   0x4   :  { %13 = vsyncpa [#allocation6], 0 }
   0x5   :  { %15 = vsyncpa [#allocation6 + $0x1], 0 }
   0x6   :  { %16 = vsyncpa [#allocation4], 0 }
   0x7   :  { %18 = vsyncpa [#allocation4 + $0x1], 0 }
   0x8   :  { %19 = vsyncpa [#allocation9], 0 }
   0x9   :  { %21 = vsyncpa [#allocation9 + $0x1], 0  ;;  %s933_s15 = smov 0   ;;  %s935_s16 = smov 0  }
   0xa   :  { %s937_s17 = smov 0   ;;  %s939_s18 = smov 0  }
   0xb   :  { %s941_s19 = smov 0   ;;  %s943_s20 = smov 0  }
   0xc LB: > { %s964_s21 = sadd.s32 4294967295, %s896_s20   ;;  %s1210_s22 = sadd.s32 4294967294, %s896_s20   ;;  %s896_s20 = sphi %s943_s20, %s27_s20   ;;  %s892_s19 = sphi %s941_s19, %s1229_s19   ;;  %s888_s18 = sphi %s939_s18, %s1228_s18   ;;  %s884_s17 = sphi %s937_s17, %s1227_s17   ;;  %s880_s16 = sphi %s935_s16, %s1226_s16   ;;  %s876_s15 = sphi %s933_s15, %s1225_s15  }
   0xd   : > { %s39_s23 = sadd.s32 1, %s892_s19  ;;  %s48_s24 = sadd.s32 1, %s884_s17 }
   0xe   : > { %p41_p0 = scmp.ge.s32.totalorder %s39_s23, 2  ;;  %p55_p1 = scmp.ne.s32.totalorder %s884_s17, %s880_s16 }
   0xf   : > { %p56_p2 = scmp.eq.s32.totalorder %s896_s20, 0  ;;  %p61_p3 = scmp.ne.s32.totalorder %s880_s16, %s876_s15 }
  0x10   : > { %s1231_s23 = smov (%p41_p0, %s39_s23), 0  ;;  %p62_p5 = scmp.eq.s32.totalorder %s964_s21, 0 }
  0x11   : > { %1213 = sst [smem:[#allocation15_spill]] %s1231_s23  ;;  %p976_p4 = por %p56_p2, %p55_p1 }
  0x12   : > { %s43_s26 = ssub.s32 %s892_s19, %s1231_s23  ;;  %p113_p6 = scmp.eq.s32.totalorder %s964_s21, 1 }
  0x13   : > { %p46_p7 = scmp.eq.s32.totalorder %s43_s26, 0  ;;  %p984_p8 = por %p62_p5, %p61_p3 }
  0x14   : > { %p988_p9 = por %p113_p6, %p55_p1  ;;  %p119_p10 = scmp.eq.s32.totalorder %s1210_s22, 1 }
  0x15   : > { %s995_s29 = scalar_select %p46_p7, %s884_s17, %s48_s24  }
  0x16   : > { %p997_p11 = por %p119_p10, %p61_p3  ;;  %p581_p12 = scmp.ge.s32.totalorder %s896_s20, 2 }
  0x17   : > { %1217 = sst [smem:[#allocation16_spill]] %s995_s29  ;;  %p645_p13 = scmp.lt.s32.totalorder %s896_s20, 2 }
  0x18   : > { %s1004_s5 = sand.u32 1, %s884_s17   ;;  %s613_s7 = sshll.u32 %s892_s19, 9 }
  0x19   : > { %s582_s6 = sshll.u32 %s1004_s5, 5  ;;  %s1219_s0 = sld [smem:[#allocation17_spill]] }
  0x1a   : > { %s195_s11 = scalar_lea.vmem [#allocation2], %s582_s6  ;;  %p1013_p0 = pnand %p645_p13, %p976_p4 }
  0x1b   : > { %s203_s12 = sshll.u32 %s195_s11, 4  ;;  %p587_p1 = scmp.ge.s32.totalorder %s896_s20, 1  ;;  %s204_s12 = int_to_ptr.vmem [resolvable:$true] %s203_s12 }
  0x1c   : > { %s192_s14 = scalar_lea.sflag [#allocation3], %s1004_s5  ;;  %p702_p2 = pneg %p1013_p0 }
  0x1d   : > { %s713_s24 = scalar_lea.vmem %s204_s12, 512  ;;  %s898_s26 = smov [#allocation2]  }
  0x1e   : > { %p714_p3 = scmp.ne.s32.totalorder %s204_s12, %s713_s24  ;;  %s718_s6 = sshll.u32 %s898_s26, 4  ;;  %s719_s6 = int_to_ptr.vmem [resolvable:$false] %s718_s6 }
  0x1f   : > { %s202_s10 = scalar_lea.hbm %s1219_s0, %s613_s7  ;;  %s720_s25 = scalar_lea.vmem %s719_s6, 1024 }
  0x20   : > { %p716_p5 = pnand %p714_p3, %p702_p2  ;;  %p721_p4 = scmp.lt.s32.totalorder %s204_s12, %s719_s6 }
  0x21   : > { %p722_p7 = scmp.lt.s32.totalorder %s720_s25, %s713_s24 }
  0x22   : > { %p717_p6 = pneg %p716_p5 }
  0x23   : > { %p723_p10 = por %p722_p7, %p721_p4 }
  0x25   : > { %p724_p13 = pnand %p723_p10, %p717_p6 }
  0x27   : > { %727 = shalt.err (!%p724_p13)
}
  0x28   : > { %s899_s7 = smov 128   ;;  %s900_s8 = smov 8  }
  0x29   : > { %631 = dma.hbm_to_vmem [thread:$0]  (!%p1013_p0), %s202_s10, 512, %s204_s12, %s192_s14, %s899_s7, %s899_s7, %s900_s8  }
  0x2a   : > { %p230_p3 = scmp.lt.s32.totalorder %s896_s20, 3  ;;  %s585_s9 = sshll.u32 %s1004_s5, 3 }
  0x2b   : > { %s586_s11 = sshll.u32 %s892_s19, 7  ;;  %s217_s22 = scalar_lea.vmem [#allocation5], %s585_s9 }
  0x2c   : > { %p1031_p5 = pnand %p587_p1, %p230_p3  ;;  %s223_s25 = scalar_lea.hbm %s1206_s1, %s586_s11 }
  0x2d   : > { %s225_s0 = sshll.u32 %s217_s22, 4  ;;  %s214_s23 = scalar_lea.sflag [#allocation6], %s1004_s5  ;;  %s226_s0 = int_to_ptr.vmem [resolvable:$true] %s225_s0 }
  0x2e   : > { %s741_s29 = scalar_lea.vmem %s226_s0, 128  ;;  %s901_s10 = smov [#allocation5]  }
  0x2f   : > { %p742_p6 = scmp.ne.s32.totalorder %s226_s0, %s741_s29  ;;  %s746_s12 = sshll.u32 %s901_s10, 4  ;;  %s747_s12 = int_to_ptr.vmem [resolvable:$false] %s746_s12 }
  0x30   : > { %s748_s14 = scalar_lea.vmem %s747_s12, 256  ;;  %p749_p1 = scmp.lt.s32.totalorder %s226_s0, %s747_s12 }
  0x31   : > { %p744_p4 = pnand %p742_p6, %p702_p2  ;;  %p750_p10 = scmp.lt.s32.totalorder %s748_s14, %s741_s29 }
  0x33   : > { %p745_p7 = pneg %p744_p4  ;;  %p751_p13 = por %p750_p10, %p749_p1 }
  0x35   : > { %p752_p3 = pnand %p751_p13, %p745_p7 }
  0x37   : > { %755 = shalt.err (!%p752_p3)
}
  0x38   : > { %634 = dma.hbm_to_vmem [thread:$0]  (!%p1013_p0), %s223_s25, 128, %s226_s0, %s214_s23  }
  0x39   : > { %234 = sbr.rel (%p1031_p5) target bundleno = 138 (0x8a), region = 28  ;;  %s1047_s22 = sand.u32 (!%p1031_p5), 1, %s880_s16  }
  0x3a   : > { %s588_s5 = sshll.u32 (!%p1031_p5), %s1047_s22, 5  ;;  %s237_s7 = scalar_lea.sflag (!%p1031_p5), [#allocation3], %s1047_s22 }
  0x3b   : > { %s240_s8 = scalar_lea.vmem (!%p1031_p5), [#allocation2], %s588_s5 }
  0x3e   : > { %859 = dma.done.wait (%p984_p8), %s237_s7, 512  }
  0x3f   : > { %861 = vsyncadd (%p984_p8), %s237_s7, 4294966784  ;;  %s589_s0 = sshll.u32 %s1047_s22, 3  ;;  %s246_s23 = scalar_lea.sflag [#allocation6], %s1047_s22 }
  0x40   : > { %s249_s29 = scalar_lea.vmem [#allocation5], %s589_s0 }
  0x41   : > { %863 = dma.done.wait (%p984_p8), %s246_s23, 128  }
  0x42   : > { %865 = vsyncadd (%p984_p8), %s246_s23, 4294967168  ;;  %s614_s13 = smul.u32 24, %s1047_s22  ;;  %s359_s9 = sand.u32 1, %s964_s21   ;;  %v590_v0 = vld [vmem:[%s240_s8 + $0x8] sm:$0xff]  ;;  %v592_v1 = vld [vmem:[%s240_s8 + $0x10] sm:$0xff]  ;;  %v902_v4 = vmov 0.0  }
  0x43   : > { %s1064_s11 = smul.u32 384, %s888_s18  ;;  %v600_v2 = vld [vmem:[%s240_s8 + $0x18] sm:$0xff]  ;;  %v302_v3 = vld [vmem:[%s249_s29] sm:$0xff]  ;;  %s1080_s14 = scalar_lea.sflag [#allocation9], %s359_s9 }
  0x44   : > { %s281_s24 = scalar_lea.vmem [#allocation8], %s614_s13  ;;  %vm305_vm0 = vcmp.eq.s32.totalorder %v302_v3, 1  ;;  %vm320_vm1 = vcmp.eq.s32.totalorder %v302_v3, 2  ;;  %vm338_vm2 = vcmp.eq.s32.totalorder %v302_v3, 3  ;;  %s1074_s18 = scalar_lea.vmem [#allocation10], %s614_s13 }
  0x45   : > { %s394_s26 = sshll.u32 %s281_s24, 4  ;;  %s1070_s10 = scalar_lea.hbm %s1208_s3, %s1064_s11  ;;  %314 = vst [vmem:[%s281_s24] sm:$0xff] %v590_v0  ;;  %597 = vst [vmem:[%s281_s24 + $0x8] sm:$0xff] %v592_v1  ;;  %v591_v5 = vsel %vm305_vm0, 1.0, %v902_v4  ;;  %v593_v6 = vsel %vm320_vm1, 1.0, %v902_v4  ;;  %v601_v7 = vsel %vm338_vm2, 1.0, %v902_v4  ;;  %s1072_s26 = int_to_ptr.vmem [resolvable:$true] %s394_s26 }
  0x46   : > { %s410_s21 = sshll.u32 %s1074_s18, 4  ;;  %605 = vst [vmem:[%s281_s24 + $0x10] sm:$0xff] %v600_v2  ;;  %s1077_s27 = scalar_lea.vmem [#allocation7], %s614_s13  ;;  %v309_v8 = vmul.f32 %v591_v5, %v590_v0  ;;  %v325_v9 = vmul.f32 %v593_v6, %v592_v1  ;;  %s1114_s21 = int_to_ptr.vmem [resolvable:$true] %s410_s21 }
  0x47   : > { %s378_s12 = sshll.u32 %s1077_s27, 4  ;;  %s756_s5 = scalar_lea.vmem %s1072_s26, 384  ;;  %s1127_s12 = int_to_ptr.vmem [resolvable:$true] %s378_s12 }
  0x48   : > { %p757_p8 = scmp.ne.s32.totalorder %s1072_s26, %s756_s5  ;;  %s903_s7 = smov [#allocation8]  }
  0x49   : > { %s760_s8 = sshll.u32 %s903_s7, 4  ;;  %s761_s8 = int_to_ptr.vmem [resolvable:$false] %s760_s8 }
  0x4a   : > { %p758_p0 = pnand %p757_p8, %p988_p9  ;;  %s762_s0 = scalar_lea.vmem %s761_s8, 768 }
  0x4b   : > { %p763_p5 = scmp.lt.s32.totalorder %s1072_s26, %s761_s8  ;;  %p764_p6 = scmp.lt.s32.totalorder %s762_s0, %s756_s5 }
  0x4c   : > { %p759_p2 = pneg %p758_p0 }
  0x4d   : > { %p765_p4 = por %p764_p6, %p763_p5 }
  0x4f   : > { %p766_p7 = pnand %p765_p4, %p759_p2 }
  0x51   : > { %769 = shalt.err (!%p766_p7)
}
  0x52   : > { %s770_s23 = scalar_lea.hbm %s1070_s10, 384  ;;  %s774_s9 = scalar_lea.hbm %s1208_s3, 768 }
  0x53   : > { %p771_p1 = scmp.ne.s32.totalorder %s1070_s10, %s770_s23  ;;  %p775_p3 = scmp.lt.s32.totalorder %s1070_s10, %s1208_s3 }
  0x54   : > { %p776_p8 = scmp.lt.s32.totalorder %s774_s9, %s770_s23 }
  0x55   : > { %p772_p10 = pnand %p771_p1, %p988_p9 }
  0x56   : > { %p777_p0 = por %p776_p8, %p775_p3 }
  0x57   : > { %p773_p13 = pneg %p772_p10 }
  0x59   : > { %p778_p2 = pnand %p777_p0, %p773_p13 }
  0x5b   : > { %781 = shalt.err (!%p778_p2)
}
  0x5c   : > { %s904_s25 = smov 128   ;;  %s905_s5 = smov 8   ;;  %v343_v10 = vmul.f32 %v601_v7, %v600_v2  ;;  %317 = vst [vmem:[%s1074_s18] sm:$0xff] %v591_v5  ;;  %599 = vst [vmem:[%s1074_s18 + $0x8] sm:$0xff] %v593_v6 }
  0x5d   : > { %623 = dma.vmem_to_hbm [thread:$0]  (%p988_p9), %s1072_s26, 384, %s1070_s10, %s1080_s14, %s904_s25, %s904_s25, %s905_s5  }
  0x5e   : > { %s1110_s0 = scalar_lea.hbm %s1209_s4, %s1064_s11  ;;  %607 = vst [vmem:[%s1074_s18 + $0x10] sm:$0xff] %v601_v7  ;;  %s1123_s13 = scalar_lea.hbm %s1207_s2, %s1064_s11  ;;  %311 = vst [vmem:[%s1077_s27] sm:$0xff] %v309_v8 }
  0x5f   : > { %595 = vst [vmem:[%s1077_s27 + $0x8] sm:$0xff] %v325_v9  ;;  %s782_s26 = scalar_lea.vmem %s1114_s21, 384  ;;  %s906_s10 = smov [#allocation10]  }
  0x60   : > { %p783_p5 = scmp.ne.s32.totalorder %s1114_s21, %s782_s26  ;;  %s786_s9 = sshll.u32 %s906_s10, 4  ;;  %s787_s9 = int_to_ptr.vmem [resolvable:$false] %s786_s9 }
  0x61   : > { %s788_s24 = scalar_lea.vmem %s787_s9, 768  ;;  %p789_p7 = scmp.lt.s32.totalorder %s1114_s21, %s787_s9 }
  0x62   : > { %p784_p6 = pnand %p783_p5, %p988_p9  ;;  %p790_p1 = scmp.lt.s32.totalorder %s788_s24, %s782_s26 }
  0x64   : > { %p785_p4 = pneg %p784_p6  ;;  %p791_p10 = por %p790_p1, %p789_p7 }
  0x66   : > { %p792_p13 = pnand %p791_p10, %p785_p4 }
  0x68   : > { %795 = shalt.err (!%p792_p13)
}
  0x69   : > { %s796_s11 = scalar_lea.hbm %s1110_s0, 384  ;;  %s800_s7 = scalar_lea.hbm %s1209_s4, 768 }
  0x6a   : > { %p797_p3 = scmp.ne.s32.totalorder %s1110_s0, %s796_s11  ;;  %p801_p2 = scmp.lt.s32.totalorder %s1110_s0, %s1209_s4 }
  0x6b   : > { %p802_p5 = scmp.lt.s32.totalorder %s800_s7, %s796_s11 }
  0x6c   : > { %p798_p8 = pnand %p797_p3, %p988_p9 }
  0x6d   : > { %p803_p6 = por %p802_p5, %p801_p2 }
  0x6e   : > { %p799_p0 = pneg %p798_p8 }
  0x70   : > { %p804_p4 = pnand %p803_p6, %p799_p0 }
  0x72   : > { %807 = shalt.err (!%p804_p4)
}
  0x73   : > { %624 = dma.vmem_to_hbm [thread:$0]  (%p988_p9), %s1114_s21, 384, %s1110_s0, %s1080_s14, %s904_s25, %s904_s25, %s905_s5  }
  0x74   : > { %603 = vst [vmem:[%s1077_s27 + $0x10] sm:$0xff] %v343_v10  ;;  %s355_s29 = scalar_lea.sflag [#allocation4], %s1047_s22  ;;  %s808_s26 = scalar_lea.vmem %s1127_s12, 384 }
  0x75   : > { %p809_p7 = scmp.ne.s32.totalorder %s1127_s12, %s808_s26  ;;  %s907_s10 = smov [#allocation7]  }
  0x76   : > { %s812_s9 = sshll.u32 %s907_s10, 4  ;;  %s813_s9 = int_to_ptr.vmem [resolvable:$false] %s812_s9 }
  0x77   : > { %p810_p1 = pnand %p809_p7, %p988_p9  ;;  %s814_s24 = scalar_lea.vmem %s813_s9, 768 }
  0x78   : > { %p815_p13 = scmp.lt.s32.totalorder %s1127_s12, %s813_s9  ;;  %p816_p3 = scmp.lt.s32.totalorder %s814_s24, %s808_s26 }
  0x79   : > { %p811_p10 = pneg %p810_p1 }
  0x7a   : > { %p817_p8 = por %p816_p3, %p815_p13 }
  0x7c   : > { %p818_p0 = pnand %p817_p8, %p811_p10 }
  0x7e   : > { %821 = shalt.err (!%p818_p0)
}
  0x7f   : > { %s822_s21 = scalar_lea.hbm %s1123_s13, 384  ;;  %s826_s14 = scalar_lea.hbm %s1207_s2, 768 }
  0x80   : > { %p823_p2 = scmp.ne.s32.totalorder %s1123_s13, %s822_s21  ;;  %p827_p4 = scmp.lt.s32.totalorder %s1123_s13, %s1207_s2 }
  0x81   : > { %p828_p7 = scmp.lt.s32.totalorder %s826_s14, %s822_s21 }
  0x82   : > { %p824_p5 = pnand %p823_p2, %p988_p9 }
  0x83   : > { %p829_p1 = por %p828_p7, %p827_p4 }
  0x84   : > { %p825_p6 = pneg %p824_p5 }
  0x86   : > { %p830_p10 = pnand %p829_p1, %p825_p6 }
  0x88   : > { %833 = shalt.err (!%p830_p10)
}
  0x89   : > { %622 = dma.vmem_to_hbm [thread:$0]  (%p988_p9), %s1127_s12, 384, %s1123_s13, %s355_s29, %s904_s25, %s904_s25, %s905_s5  }
  0x8a PF: > { %s425_s18 = sand.u32 1, %s876_s15   ;;  %p636_p13 = pnand %p581_p12, %p997_p11 }
  0x8b   : > { %s426_s6 = scalar_lea.sflag [#allocation4], %s425_s18 }
  0x8c   : > { %p637_p3 = pneg %p636_p13 }
  0x8e   : > { %867 = dma.done.wait (%p637_p3), %s426_s6, 384  }
  0x8f   : > { %869 = vsyncadd (%p637_p3), %s426_s6, 4294966912  ;;  %s1222_s28 = sadd.s32 4294967294, %s896_s20  }
  0x90   : > { %s434_s7 = sand.u32 1, %s1222_s28  }
  0x91   : > { %s435_s8 = scalar_lea.sflag [#allocation9], %s434_s7 }
  0x92   : > { %871 = dma.done.wait (%p637_p3), %s435_s8, 768  }
  0x93   : > { %873 = vsyncadd (%p637_p3), %s435_s8, 4294966528  ;;  %s27_s20 = sadd.s32 1, %s896_s20   ;;  %s1223_s12 = sld [smem:[#allocation16_spill]] }
  0x94   : > { %p24_p9 = scmp.ge.s32.totalorder %s27_s20, 4   ;;  %s1224_s30 = sld [smem:[#allocation15_spill]] }
  0x95   : > { %s1225_s15 = smov %s880_s16  ;;  %s1226_s16 = smov %s884_s17 }
  0x96   : > { %s1228_s18 = smov %s892_s19  ;;  %26 = sbr.rel (!%p24_p9) target bundleno = 12 (0xc), region = 131 }
  0x99   : > { %s1227_s17 = smov %s1223_s12 }
  0x9a   : > { %s1229_s19 = smov %s1224_s30 }
  0x9b   :  { %449 = vsyncpa [#allocation3], 1 }
  0x9c   :  { %451 = vsyncpa [#allocation3 + $0x1], 1 }
  0x9d   :  { %452 = vsyncpa [#allocation6], 1 }
  0x9e   :  { %454 = vsyncpa [#allocation6 + $0x1], 1 }
  0x9f   :  { %455 = vsyncpa [#allocation4], 1 }
  0xa0   :  { %457 = vsyncpa [#allocation4 + $0x1], 1 }
  0xa1   :  { %458 = vsyncpa [#allocation9], 1 }
  0xa2   :  { %460 = vsyncpa [#allocation9 + $0x1], 1 }

</bundles_post_ra>
